<compile_context>
chip_gen: v7x
topology: tpu7x:2x2x1
jax: 0.10.0
libtpu: 0.0.40
codegen_flags: <defaults>
</compile_context>

<pallas_src>
import functools

import jax
import jax.numpy as jnp
from jax.experimental import pallas as pl
from jax.experimental.pallas import tpu as pltpu


def _round_up(x, m):
    return ((x + m - 1) // m) * m


def _cdiv(a, b):
    return (a + b - 1) // b


def _name_mlp_kernel(x_ref, w1_ref, b1_ref, w2_ref, b2_ref, o_ref, *, mxu_dtype):
    # First linear: bf16 (or f32) MXU operands, f32 accumulation.
    x = x_ref[...].astype(mxu_dtype)
    w1 = w1_ref[...].astype(mxu_dtype)
    h = jnp.dot(x, w1, preferred_element_type=jnp.float32)
    h = jnp.maximum(h + b1_ref[...], 0.0)          # (tm, H) + (1, H), f32 VPU

    # Second linear + sigmoid.  Bias add and sigmoid stay f32 (EUP exp/recip).
    w2 = w2_ref[...].astype(mxu_dtype)
    o = jnp.dot(h.astype(mxu_dtype), w2, preferred_element_type=jnp.float32)
    o = o + b2_ref[...]                            # (tm, N) + (1, N)
    o_ref[...] = jax.nn.sigmoid(o).astype(o_ref.dtype)


def name_forward(x, w1, b1, w2, b2, *, tm=4096, mxu_dtype=jnp.bfloat16):
    """x: (..., E); w1: (E, 2E); b1: (2E,); w2: (2E, N); b2: (N,) -> (..., N).

    Arbitrary leading dims are flattened into rows (like nn.Linear).
    """
    E, H = w1.shape
    N = w2.shape[1]

    lead_shape = x.shape[:-1]
    x2d = x.reshape(-1, E)
    M = x2d.shape[0]

    # Row tile: multiple of 8, capped at tm; no input padding — the grid uses
    # cdiv and Pallas masks the ragged last block.
    tm_eff = min(tm, _round_up(M, 8))
    # Ensure >= 2 grid steps when there is enough work so the "parallel" axis
    # can shard across both TensorCores on v7x (megacore).
    if _cdiv(M, tm_eff) < 2 and M > 8:
        tm_eff = max(8, _round_up(_cdiv(M, 2), 8))
    grid = (_cdiv(M, tm_eff),)

    b1_2d = b1.reshape(1, H)
    b2_2d = b2.reshape(1, N)

    itemsize = jnp.dtype(x.dtype).itemsize
    w_itemsize = jnp.dtype(w1.dtype).itemsize
    cost = pl.CostEstimate(
        flops=2 * M * (E * H + H * N),
        transcendentals=M * N,                     # sigmoid ~ one exp per element
        bytes_accessed=(M * (E + N)) * itemsize
        + (w1.size + b1.size + w2.size + b2.size) * w_itemsize,
    )

    kernel = functools.partial(_name_mlp_kernel, mxu_dtype=mxu_dtype)

    out = pl.pallas_call(
        kernel,
        out_shape=jax.ShapeDtypeStruct((M, N), x.dtype),
        grid=grid,
        in_specs=[
            pl.BlockSpec((tm_eff, E), lambda i: (i, 0)),   # x row tile
            pl.BlockSpec((E, H), lambda i: (0, 0)),        # W1 (resident)
            pl.BlockSpec((1, H), lambda i: (0, 0)),        # b1
            pl.BlockSpec((H, N), lambda i: (0, 0)),        # W2 (resident)
            pl.BlockSpec((1, N), lambda i: (0, 0)),        # b2
        ],
        out_specs=pl.BlockSpec((tm_eff, N), lambda i: (i, 0)),
        compiler_params=pltpu.CompilerParams(
            dimension_semantics=("parallel",)),
        cost_estimate=cost,
    )(x2d, w1, b1_2d, w2, b2_2d)

    return out.reshape(*lead_shape, N)


def _ref_forward(x, w1, b1, w2, b2):
    h = jnp.maximum(x @ w1 + b1, 0.0)
    return jax.nn.sigmoid(h @ w2 + b2)


if __name__ == "__main__":
    e_model = 32     # hidden size
    names = 16       # number of output classes
    batch, seq = 2, 8

    key = jax.random.PRNGKey(0)
    kx, kw1, kb1, kw2, kb2 = jax.random.split(key, 5)

    x = jax.random.normal(kx, (batch, seq, e_model), dtype=jnp.float32)
    # Deterministic parameter init (Kaiming-ish scaling, stored as (in, out)).
    w1 = jax.random.normal(kw1, (e_model, e_model * 2), dtype=jnp.float32) * (1.0 / e_model) ** 0.5
    b1 = jax.random.normal(kb1, (e_model * 2,), dtype=jnp.float32) * 0.01
    w2 = jax.random.normal(kw2, (e_model * 2, names), dtype=jnp.float32) * (1.0 / (e_model * 2)) ** 0.5
    b2 = jax.random.normal(kb2, (names,), dtype=jnp.float32) * 0.01

    ref = _ref_forward(x, w1, b1, w2, b2)

    # Default path: bf16 MXU operands, f32 accumulation (tolerance relaxed by
    # design — precision change, not a bug).
    out = jax.block_until_ready(name_forward(x, w1, b1, w2, b2))
    assert out.shape == (batch, seq, names)
    assert jnp.allclose(out, ref, atol=2e-2, rtol=0.0), "mismatch vs reference (bf16)"

    # Exact f32 path still matches tightly.
    out_f32 = jax.block_until_ready(
        name_forward(x, w1, b1, w2, b2, mxu_dtype=jnp.float32))
    assert jnp.allclose(out_f32, ref, atol=1e-5, rtol=1e-5), "mismatch vs reference (f32)"

    # Row count not a multiple of 8: exercises the masked ragged last block
    # (no wrapper-side padding of x any more).
    x_odd = jax.random.normal(kx, (5, e_model), dtype=jnp.float32)
    out_odd = jax.block_until_ready(name_forward(x_odd, w1, b1, w2, b2))
    ref_odd = _ref_forward(x_odd, w1, b1, w2, b2)
    assert out_odd.shape == (5, names)
    assert jnp.allclose(out_odd, ref_odd, atol=2e-2, rtol=0.0), "mismatch (ragged rows)"

    print("KERNEL_OK")
</pallas_src>

<mosaic_0001>
module attributes {stable_mosaic.version = 11 : i64} {
  func.func @_name_mlp_kernel(%arg0: i32, %arg1: memref<8x32xf32, #tpu.memory_space<vmem>>, %arg2: memref<32x64xf32, #tpu.memory_space<vmem>>, %arg3: memref<1x64xf32, #tpu.memory_space<vmem>>, %arg4: memref<64x16xf32, #tpu.memory_space<vmem>>, %arg5: memref<1x16xf32, #tpu.memory_space<vmem>>, %arg6: memref<8x16xf32, #tpu.memory_space<vmem>>) attributes {dimension_semantics = [#tpu.dimension_semantics<parallel>], iteration_bounds = array<i64: 2>, scalar_prefetch = 0 : i64, scratch_operands = 0 : i64, tpu.core_type = #tpu.core_type<tc>, window_params = [{transform_indices = @transform_0, window_bounds = array<i64: 8, 32>}, {pipeline_mode = #tpu.pipeline_mode<synchronous>, transform_indices = @transform_1, window_bounds = array<i64: 32, 64>}, {pipeline_mode = #tpu.pipeline_mode<synchronous>, transform_indices = @transform_2, window_bounds = array<i64: 1, 64>}, {pipeline_mode = #tpu.pipeline_mode<synchronous>, transform_indices = @transform_3, window_bounds = array<i64: 64, 16>}, {pipeline_mode = #tpu.pipeline_mode<synchronous>, transform_indices = @transform_4, window_bounds = array<i64: 1, 16>}, {transform_indices = @transform_5, window_bounds = array<i64: 8, 16>}]} {
    %c0 = arith.constant 0 : index
    %c0_0 = arith.constant 0 : index
    %0 = vector.load %arg1[%c0, %c0_0] : memref<8x32xf32, #tpu.memory_space<vmem>>, vector<8x32xf32>
    %1 = arith.truncf %0 : vector<8x32xf32> to vector<8x32xbf16>
    %c0_1 = arith.constant 0 : index
    %c0_2 = arith.constant 0 : index
    %2 = vector.load %arg2[%c0_1, %c0_2] : memref<32x64xf32, #tpu.memory_space<vmem>>, vector<32x64xf32>
    %3 = arith.truncf %2 : vector<32x64xf32> to vector<32x64xbf16>
    %cst = arith.constant dense<0.000000e+00> : vector<8x64xf32>
    %4 = tpu.matmul %1, %3, %cst {dimension_numbers = #tpu.dot_dimension_numbers<[1], [0], [0], [1], [0, 0, 1, 1], [], []>} : vector<8x32xbf16>, vector<32x64xbf16>, vector<8x64xf32> -> vector<8x64xf32>
    %c0_3 = arith.constant 0 : index
    %c0_4 = arith.constant 0 : index
    %5 = vector.load %arg3[%c0_3, %c0_4] : memref<1x64xf32, #tpu.memory_space<vmem>>, vector<1x64xf32>
    %6 = vector.broadcast %5 : vector<1x64xf32> to vector<8x64xf32>
    %7 = arith.addf %4, %6 : vector<8x64xf32>
    %cst_5 = arith.constant 0.000000e+00 : f32
    %8 = vector.broadcast %cst_5 : f32 to vector<8x64xf32>
    %9 = arith.maximumf %7, %8 : vector<8x64xf32>
    %c0_6 = arith.constant 0 : index
    %c0_7 = arith.constant 0 : index
    %10 = vector.load %arg4[%c0_6, %c0_7] : memref<64x16xf32, #tpu.memory_space<vmem>>, vector<64x16xf32>
    %11 = arith.truncf %10 : vector<64x16xf32> to vector<64x16xbf16>
    %12 = arith.truncf %9 : vector<8x64xf32> to vector<8x64xbf16>
    %cst_8 = arith.constant dense<0.000000e+00> : vector<8x16xf32>
    %13 = tpu.matmul %12, %11, %cst_8 {dimension_numbers = #tpu.dot_dimension_numbers<[1], [0], [0], [1], [0, 0, 1, 1], [], []>} : vector<8x64xbf16>, vector<64x16xbf16>, vector<8x16xf32> -> vector<8x16xf32>
    %c0_9 = arith.constant 0 : index
    %c0_10 = arith.constant 0 : index
    %14 = vector.load %arg5[%c0_9, %c0_10] : memref<1x16xf32, #tpu.memory_space<vmem>>, vector<1x16xf32>
    %15 = vector.broadcast %14 : vector<1x16xf32> to vector<8x16xf32>
    %16 = arith.addf %13, %15 : vector<8x16xf32>
    %17 = arith.negf %16 : vector<8x16xf32>
    %18 = math.exp %17 : vector<8x16xf32>
    %cst_11 = arith.constant 1.000000e+00 : f32
    %19 = vector.broadcast %cst_11 : f32 to vector<8x16xf32>
    %20 = arith.addf %19, %18 : vector<8x16xf32>
    %21 = arith.divf %19, %20 : vector<8x16xf32>
    %c0_12 = arith.constant 0 : index
    %c0_13 = arith.constant 0 : index
    %22 = vector.load %arg6[%c0_12, %c0_13] : memref<8x16xf32, #tpu.memory_space<vmem>>, vector<8x16xf32>
    tpu.vector_store %arg6[%c0_12, %c0_13], %21 {strides = array<i32>} : memref<8x16xf32, #tpu.memory_space<vmem>>, vector<8x16xf32>,
    return
  }
  func.func @transform_0(%arg0: i32) -> (i32, i32) {
    %c0_i32 = arith.constant 0 : i32
    %c0_i32_0 = arith.constant 0 : i32
    return %arg0, %c0_i32 : i32, i32
  }
  func.func @transform_1(%arg0: i32) -> (i32, i32) {
    %c0_i32 = arith.constant 0 : i32
    %c0_i32_0 = arith.constant 0 : i32
    %c0_i32_1 = arith.constant 0 : i32
    return %c0_i32, %c0_i32_0 : i32, i32
  }
  func.func @transform_2(%arg0: i32) -> (i32, i32) {
    %c0_i32 = arith.constant 0 : i32
    %c0_i32_0 = arith.constant 0 : i32
    %c0_i32_1 = arith.constant 0 : i32
    return %c0_i32, %c0_i32_0 : i32, i32
  }
  func.func @transform_3(%arg0: i32) -> (i32, i32) {
    %c0_i32 = arith.constant 0 : i32
    %c0_i32_0 = arith.constant 0 : i32
    %c0_i32_1 = arith.constant 0 : i32
    return %c0_i32, %c0_i32_0 : i32, i32
  }
  func.func @transform_4(%arg0: i32) -> (i32, i32) {
    %c0_i32 = arith.constant 0 : i32
    %c0_i32_0 = arith.constant 0 : i32
    %c0_i32_1 = arith.constant 0 : i32
    return %c0_i32, %c0_i32_0 : i32, i32
  }
  func.func @transform_5(%arg0: i32) -> (i32, i32) {
    %c0_i32 = arith.constant 0 : i32
    %c0_i32_0 = arith.constant 0 : i32
    return %arg0, %c0_i32 : i32, i32
  }
}

</mosaic_0001>

<bundles_post_ra>
// kernel: tpu_custom_call.1
= control target key start
LH: loop header
LB: loop body
LE: loop exit
PB: predicated region body
PF: predicated region fallthrough
CT: control target
= control target key end

     0   :  { %10 = vsyncpa [#allocation3], 0  ;;  %s753_s0 = inlined_call_operand.vmem [shape: f32[16,32], index: 0, kind: input, shape index: {}]   ;;  %s754_s1 = inlined_call_operand.vmem [shape: f32[32,64], index: 1, kind: input, shape index: {}]   ;;  %s755_s2 = inlined_call_operand.vmem [shape: f32[1,64], index: 2, kind: input, shape index: {}]   ;;  %s756_s3 = inlined_call_operand.vmem [shape: f32[64,16], index: 3, kind: input, shape index: {}]   ;;  %s757_s4 = inlined_call_operand.vmem [shape: f32[1,16], index: 4, kind: input, shape index: {}]   ;;  %s758_s5 = inlined_call_operand.hbm [shape: f32[16,16], index: 5, kind: output, shape index: {}]  }
   0x1   :  { %12 = vsyncpa [#allocation3 + $0x1], 0  ;;  %s611_s18 = smov 0   ;;  %s613_s19 = smov 0  }
   0x2   :  { %s615_s20 = smov 0   ;;  %s617_s21 = smov 0  }
   0x3 LB: > { %s632_s22 = sadd.s32 4294967295, %s576_s21   ;;  %s426_s23 = sadd.s32 4294967294, %s576_s21   ;;  %s576_s21 = sphi %s617_s21, %s764_s21   ;;  %s572_s20 = sphi %s615_s20, %s763_s20   ;;  %s568_s19 = sphi %s613_s19, %s762_s19   ;;  %s564_s18 = sphi %s611_s18, %s761_s18  }
   0x4   : > { %s636_s24 = sadd.s32 1, %s576_s21   ;;  %s135_s25 = sadd.s32 1, %s572_s20 }
   0x5   : > { %s132_s26 = ssub.s32 %s576_s21, %s636_s24  ;;  %p145_p0 = scmp.ne.s32.totalorder %s572_s20, %s568_s19 }
   0x6   : > { %p133_p1 = scmp.eq.s32.totalorder %s132_s26, 0  ;;  %p146_p2 = scmp.eq.s32.totalorder %s632_s22, 1 }
   0x7   : > { %p151_p3 = scmp.ne.s32.totalorder %s568_s19, %s564_s18  ;;  %p152_p4 = scmp.eq.s32.totalorder %s426_s23, 1 }
   0x8   : > { %s647_s27 = scalar_select %p133_p1, %s572_s20, %s135_s25  }
   0x9   : > { %p649_p5 = por %p146_p2, %p145_p0  ;;  %p653_p6 = por %p152_p4, %p151_p3 }
   0xa   : > { %p429_p7 = scmp.ge.s32.totalorder %s576_s21, 1  ;;  %p189_p8 = scmp.lt.s32.totalorder %s576_s21, 3 }
   0xc   : > { %p190_p9 = pnand %p429_p7, %p189_p8 }
   0xd   : > { %v223_v0 = vld [vmem:[%s754_s1] sm:$0xff] (!%p190_p9)  ;;  %v224_v1 = vld [vmem:[%s754_s1 + $0x8] sm:$0xff] (!%p190_p9)  ;;  %v225_v2 = vld [vmem:[%s754_s1 + $0x10] sm:$0xff] (!%p190_p9)  ;;  %p216_p10 = scmp.lt.s32.totalorder (!%p190_p9), %s632_s22, 1  ;;  %v578_v3 = vmov (!%p190_p9), 0.0   ;;  %vm579_vm0 = vmmov (!%p190_p9), 0  }
   0xe   : > { %193 = sbr.rel (%p190_p9) target bundleno = 500 (0x1f4), region = 40  ;;  %449 = vmatprep.subr.bf16.mxu0 (!%p190_p9), %v578_v3  ;;  %v227_v4 = vpack.c.bf16 (!%p190_p9), %v224_v1, %v223_v0  ;;  %v226_v5 = vld [vmem:[%s754_s1 + $0x18] sm:$0xff] (!%p190_p9)  ;;  %453 = vmatprep.mubr.msk.bf16.mxu0 (!%p190_p9), %vm579_vm0, %v578_v3  ;;  %v281_v6 = vld [vmem:[%s756_s3] sm:$0xff] (!%p190_p9)  ;;  %v282_v7 = vld [vmem:[%s756_s3 + $0x8] sm:$0xff] (!%p190_p9)  ;;  %vm236_vm1 = vcmask (!%p190_p9), 261120   ;;  %vm301_vm2 = vcmask (!%p190_p9), 523264  }
   0xf   : > { %457 = vmatprep.subr.bf16.mxu1 (!%p190_p9), %v578_v3  ;;  %v289_v8 = vpack.c.bf16 (!%p190_p9), %v282_v7, %v281_v6  ;;  %v283_v9 = vld [vmem:[%s756_s3 + $0x10] sm:$0xff] (!%p190_p9)  ;;  %v284_v10 = vld [vmem:[%s756_s3 + $0x18] sm:$0xff] (!%p190_p9)  ;;  %465 = vmatprep.mubr.msk.bf16.mxu1 (!%p190_p9), %vm579_vm0, %v578_v3  ;;  %v228_v11 = vpack.c.bf16 (!%p190_p9), %v226_v5, %v225_v2  ;;  %v285_v15 = vld [vmem:[%s756_s3 + $0x20] sm:$0xff] (!%p190_p9)  ;;  %s438_s8 = sshll.u32 (!%p190_p9), %s632_s22, 7  ;;  %vm351_vm3 = vcmask (!%p190_p9), 130048  }
  0x10   : > { %450 = vmatpush3.bf16.msra.mxu0 (!%p190_p9), %v227_v4  ;;  %v290_v12 = vpack.c.bf16 (!%p190_p9), %v284_v10, %v283_v9  ;;  %v286_v16 = vld [vmem:[%s756_s3 + $0x28] sm:$0xff] (!%p190_p9)  ;;  %v287_v18 = vld [vmem:[%s756_s3 + $0x30] sm:$0xff] (!%p190_p9)  ;;  %v288_v19 = vld [vmem:[%s756_s3 + $0x38] sm:$0xff] (!%p190_p9)  ;;  %s711_s13 = scalar_lea.hbm (!%p190_p9), %s758_s5, %s438_s8 }
  0x11   : > { %451 = vmatprep.subr.bf16.mxu0 (!%p190_p9), %v578_v3  ;;  %458 = vmatpush3.bf16.msra.mxu1 (!%p190_p9), %v289_v8  ;;  %v291_v17 = vpack.c.bf16 (!%p190_p9), %v286_v16, %v285_v15  ;;  %v292_v20 = vpack.c.bf16 (!%p190_p9), %v288_v19, %v287_v18  ;;  %v432_v21 = vld [vmem:[%s755_s2] ss:$0 sm:$0xff] (!%p190_p9) }
  0x12   : > { %459 = vmatprep.subr.bf16.mxu1 (!%p190_p9), %v578_v3  ;;  %v434_v29 = vld [vmem:[%s757_s4] ss:$0 sm:$0xff] (!%p190_p9) }
  0x14   : > { %452 = vmatpush3.bf16.msra.mxu0 (!%p190_p9), %v228_v11 }
  0x15   : > { %s217_s17 = scalar_select %p216_p10, %s632_s22, 1  ;;  %460 = vmatpush3.bf16.msra.mxu1 %v290_v12 }
  0x16   : > { %461 = vmatprep.subr.bf16.mxu1 %v578_v3  ;;  %s580_s22 = smov [#allocation2]  }
  0x17   : > { %s431_s6 = sshll.u32 %s217_s17, 3  ;;  %s518_s16 = sshll.u32 %s580_s22, 4  ;;  %s519_s16 = int_to_ptr.vmem [resolvable:$false] %s518_s16 }
  0x18   : > { %s219_s9 = scalar_lea.vmem %s753_s0, %s431_s6  ;;  %s213_s6 = sand.u32 1, %s568_s19  }
  0x19   : > { %v221_v13 = vld [vmem:[%s219_s9] sm:$0xff]  ;;  %462 = vmatpush3.bf16.msra.mxu1 %v291_v17  ;;  %s430_s7 = sshll.u32 %s213_s6, 3  ;;  %s354_s14 = scalar_lea.sflag [#allocation3], %s213_s6 }
  0x1a   : > { %v222_v14 = vpack.c.bf16 %v221_v13, %v221_v13  ;;  %463 = vmatprep.subr.bf16.mxu1 %v578_v3  ;;  %s215_s9 = scalar_lea.vmem [#allocation2], %s430_s7  ;;  %s520_s17 = scalar_lea.vmem %s519_s16, 256 }
  0x1b   : > { %s367_s10 = sshll.u32 %s215_s9, 4  ;;  %s713_s10 = int_to_ptr.vmem [resolvable:$true] %s367_s10 }
  0x1c   : > { %454 = vmatmul.mubr.msk.bf16.vlgmr.msra.gmra.mrb[0].mxu0 %vm236_vm1, %v222_v14  ;;  %s514_s15 = scalar_lea.vmem %s713_s10, 128  ;;  %p521_p0 = scmp.lt.s32.totalorder %s713_s10, %s519_s16 }
  0x1d   : > { %464 = vmatpush3.bf16.msra.mxu1 %v292_v20  ;;  %p515_p11 = scmp.ne.s32.totalorder %s713_s10, %s514_s15  ;;  %p522_p1 = scmp.lt.s32.totalorder %s520_s17, %s514_s15 }
  0x1f   : > { %p516_p12 = pnand %p515_p11, %p649_p5  ;;  %p523_p2 = por %p522_p1, %p521_p0 }
  0x21   : > { %p517_p13 = pneg %p516_p12 }
  0x23   : > { %p524_p3 = pnand %p523_p2, %p517_p13 }
  0xef   : > { %v274_v22 = vpop.f32.mrb[0].mxu0 }
  0xf0   : > { %v275_v23 = vadd.f32 %v432_v21, %v274_v22  ;;  %v455_v24 = vpop.f32.mrb[1].mxu0 }
  0xf1   : > { %v277_v25 = vpop.f32.mrb[2].mxu0 }
  0xf2   : > { %v280_v26 = vmax.f32 %v275_v23, 0.0  ;;  %v456_v27 = vpop.f32.mrb[3].mxu0 }
  0xf4   : > { %v293_v28 = vpack.c.bf16 %v280_v26, %v280_v26 }
  0xf6   : > { %466 = vmatmul.mubr.msk.bf16.vlgmr.msra.gmra.mrb[0].mxu1 %vm301_vm2, %v293_v28 }
 0x1c9   : > { %v339_v30 = vpop.f32.mrb[0].mxu1 }
 0x1ca   : > { %v340_v31 = vadd.f32 %v434_v29, %v339_v30  ;;  %v467_v32 = vpop.f32.mrb[1].mxu1 }
 0x1cb   : > { %v342_v33 = vpop.f32.mrb[2].mxu1 }
 0x1cc   : > { %v436_v34 = vmul.f32 -1.442695, %v340_v31  ;;  %v468_v35 = vpop.f32.mrb[3].mxu1 }
 0x1ce   : > { %510 = vpow2.f32 %v436_v34 }
 0x1d8   : > { %v511_v36 = vpop.eup %510 }
 0x1d9   : > { %v348_v37 = vadd.f32 1.0, %v511_v36 }
 0x1db   : > { %512 = vrcp.f32 %v348_v37 }
 0x1e5   : > { %v513_v38 = vpop.eup %512 }
 0x1e6   : > { %352 = vst.msk [vmem:[%s215_s9] sm:$0xff] %vm351_vm3, %v513_v38 }
 0x1e7   : > { %527 = shalt.err (!%p524_p3)
}
 0x1e8   : > { %s528_s23 = scalar_lea.hbm %s711_s13, 128  ;;  %s532_s30 = scalar_lea.hbm %s758_s5, 256 }
 0x1e9   : > { %p529_p4 = scmp.ne.s32.totalorder %s711_s13, %s528_s23  ;;  %p533_p9 = scmp.lt.u32.totalorder %s711_s13, %s758_s5 }
 0x1ea   : > { %p534_p10 = scmp.lt.u32.totalorder %s532_s30, %s528_s23  ;;  %p536_p12 = scmp.lt.u32.totalorder %s528_s23, %s711_s13 }
 0x1eb   : > { %p530_p7 = pnand %p529_p4, %p649_p5 }
 0x1ec   : > { %p535_p11 = por %p534_p10, %p533_p9 }
 0x1ed   : > { %p531_p8 = pneg %p530_p7 }
 0x1ee   : > { %p537_p13 = por %p536_p12, %p535_p11 }
 0x1f0   : > { %p538_p0 = pnand %p537_p13, %p531_p8 }
 0x1f2   : > { %541 = shalt.err (!%p538_p0)
}
 0x1f3   : > { %469 = dma.vmem_to_hbm [thread:$0]  (%p649_p5), %s713_s10, 128, %s711_s13, %s354_s14  }
 0x1f4 PF: > { %p475_p1 = scmp.ge.s32.totalorder %s576_s21, 2  ;;  %s379_s8 = sand.u32 1, %s564_s18  }
 0x1f5   : > { %s380_s9 = scalar_lea.sflag [#allocation3], %s379_s8 }
 0x1f6   : > { %p472_p2 = pnand %p475_p1, %p653_p6 }
 0x1f8   : > { %559 = dma.done.wait (!%p472_p2), %s380_s9, 128  }
 0x1f9   : > { %561 = vsyncadd (!%p472_p2), %s380_s9, 4294967168  ;;  %p15_p3 = scmp.ge.s32.totalorder %s636_s24, 4   ;;  %s761_s18 = smov %s568_s19 }
 0x1fa   : > { %s762_s19 = smov %s572_s20  ;;  %s763_s20 = smov %s647_s27 }
 0x1fb   : > { %s764_s21 = smov %s636_s24  ;;  %17 = sbr.rel (!%p15_p3) target bundleno = 3 (0x3), region = 75 }
 0x202   :  { %385 = vsyncpa [#allocation3], 1 }
 0x203   :  { %387 = vsyncpa [#allocation3 + $0x1], 1 }

</bundles_post_ra>
